<compile_context>
chip_gen: v7x
topology: tpu7x:2x2x1
jax: 0.10.0
libtpu: 0.0.40
codegen_flags: <defaults>
</compile_context>

<pallas_src>
import functools

import jax
import jax.numpy as jnp
from jax.experimental import pallas as pl
from jax.experimental.pallas import tpu as pltpu


# ---------------------------------------------------------------------------
# Kernels
# ---------------------------------------------------------------------------

def _meanpool_fused_kernel(x_ref, w_ref, b_ref, out_ref, acc_ref, *, inv_s):
    # x_ref:   (TB, TS, Din)  VMEM  -- streamed tile of encoder_outputs
    # w_ref:   (Din, Dv)      VMEM  -- full weight, resident (single-buffered)
    # b_ref:   (1, Dv)        VMEM  -- bias, resident
    # out_ref: (TB, Dv)       VMEM  -- resident across the seq grid axis
    # acc_ref: (TB, Din)      VMEM scratch -- partial seq-sum accumulator
    s = pl.program_id(1)

    @pl.when(s == 0)
    def _():
        acc_ref[...] = jnp.zeros_like(acc_ref)

    # Partial sum over the streamed seq tile (VPU/XLU reduce, no MXU work).
    acc_ref[...] += jnp.sum(x_ref[...].astype(jnp.float32), axis=1)

    @pl.when(s == pl.num_programs(1) - 1)
    def _():
        xm = acc_ref[...] * inv_s                                     # (TB, Din) mean
        y = jnp.dot(xm, w_ref[...].astype(jnp.float32),
                    preferred_element_type=jnp.float32)
        out_ref[...] = (y + b_ref[...]).astype(out_ref.dtype)


def _mean_only_kernel(x_ref, out_ref, acc_ref, *, inv_s):
    # Used when the weight is too large to keep resident in VMEM (e.g. v7x with
    # very large Din*Dv); the matmul + bias then runs in plain XLA afterwards.
    s = pl.program_id(1)

    @pl.when(s == 0)
    def _():
        acc_ref[...] = jnp.zeros_like(acc_ref)

    acc_ref[...] += jnp.sum(x_ref[...].astype(jnp.float32), axis=1)

    @pl.when(s == pl.num_programs(1) - 1)
    def _():
        out_ref[...] = (acc_ref[...] * inv_s).astype(out_ref.dtype)


# ---------------------------------------------------------------------------
# Tiling / wrapper
# ---------------------------------------------------------------------------

_X_BUF_BUDGET_BYTES = 8 * 1024 * 1024    # per x buffer; double-buffered -> 16 MiB stream
_WEIGHT_FUSE_LIMIT_BYTES = 8 * 1024 * 1024
_VMEM_LIMIT_CAP_BYTES = 48 * 1024 * 1024  # below v7x's 64 MiB physical VMEM


def _pick_tile(n, cap):
    """Largest tile <= cap that divides n, preferring sublane-aligned (x8) sizes.

    Falls back to the full extent n, which is always a legal block shape.
    """
    cap = min(n, max(int(cap), 1))
    if n <= cap:
        return n
    for d in range(cap, 0, -1):
        if n % d == 0 and d % 8 == 0:
            return d
    return n


def mean_pool(hidden, encoder_outputs, weight, bias):
    """hidden: (B, H); encoder_outputs: (B, S, Din); weight: (Din, Dv); bias: (Dv,)."""
    B, S, Din = encoder_outputs.shape
    Dv = weight.shape[1]
    assert hidden.shape[0] == B

    x_itemsize = jnp.dtype(encoder_outputs.dtype).itemsize
    w_bytes = Din * Dv * jnp.dtype(weight.dtype).itemsize
    b_bytes = Dv * 4

    # --- Byte-budgeted tile selection --------------------------------------
    TB = _pick_tile(B, 128)
    ts_cap = max(1, _X_BUF_BUDGET_BYTES // max(1, TB * Din * x_itemsize))
    TS = _pick_tile(S, ts_cap)
    grid = (B // TB, S // TS)

    # Fuse the epilogue matmul only if the full weight comfortably fits VMEM.
    fuse_matmul = w_bytes <= _WEIGHT_FUSE_LIMIT_BYTES
    out_cols = Dv if fuse_matmul else Din

    inv_s = 1.0 / S
    bias2d = bias.reshape(1, Dv).astype(jnp.float32)

    def _run(single_buffer_wb):
        x_tile_bytes = TB * TS * Din * x_itemsize
        wb_copies = 1 if single_buffer_wb else 2
        need = (2 * x_tile_bytes                                   # x double buffers
                + (wb_copies * (w_bytes + b_bytes) if fuse_matmul else 0)
                + TB * Din * 4                                     # acc scratch
                + 2 * TB * out_cols * 4)                           # out (double-buffered)
        vmem_limit = int(min(_VMEM_LIMIT_CAP_BYTES,
                             max(need * 5 // 4 + (1 << 20), 16 * 1024 * 1024)))

        x_spec = pl.BlockSpec((TB, TS, Din), lambda b, s: (b, s, 0))
        out_spec = pl.BlockSpec((TB, out_cols), lambda b, s: (b, 0))
        compiler_params = pltpu.CompilerParams(
            dimension_semantics=("parallel", "arbitrary"),
            vmem_limit_bytes=vmem_limit,
        )

        if fuse_matmul:
            wb_kwargs = (dict(pipeline_mode=pl.Buffered(1))
                         if single_buffer_wb else {})
            in_specs = [
                x_spec,
                pl.BlockSpec((Din, Dv), lambda b, s: (0, 0), **wb_kwargs),
                pl.BlockSpec((1, Dv), lambda b, s: (0, 0), **wb_kwargs),
            ]
            kernel = functools.partial(_meanpool_fused_kernel, inv_s=inv_s)
            args = (encoder_outputs, weight, bias2d)
        else:
            in_specs = [x_spec]
            kernel = functools.partial(_mean_only_kernel, inv_s=inv_s)
            args = (encoder_outputs,)

        return pl.pallas_call(
            kernel,
            out_shape=jax.ShapeDtypeStruct((B, out_cols), jnp.float32),
            grid_spec=pltpu.PrefetchScalarGridSpec(
                num_scalar_prefetch=0,
                grid=grid,
                in_specs=in_specs,
                out_specs=out_spec,
                scratch_shapes=[pltpu.VMEM((TB, Din), jnp.float32)],
            ),
            compiler_params=compiler_params,
        )(*args)

    try:
        out = _run(single_buffer_wb=True)
    except Exception:
        # Fallback if this JAX build rejects pl.Buffered(1) single-buffering.
        out = _run(single_buffer_wb=False)

    if not fuse_matmul:
        # Tiny epilogue in XLA: (B, Din) @ (Din, Dv) + bias.
        out = out @ weight.astype(jnp.float32) + bias.astype(jnp.float32)

    # alpha = softmax(zeros((B, S))) is the constant uniform distribution 1/S.
    alpha = jnp.full((B, S), inv_s, dtype=jnp.float32)
    return out, alpha


if __name__ == "__main__":
    key = jax.random.PRNGKey(0)
    B, S, Din, Dv = 2, 8, 32, 32

    k1, k2, k3, k4 = jax.random.split(key, 4)
    encoder_outputs = jax.random.normal(k1, (B, S, Din), dtype=jnp.float32)
    hidden = jax.random.normal(k2, (B, Dv), dtype=jnp.float32)

    # Deterministic parameter init (mimics nn.Linear uniform(-1/sqrt(Din), 1/sqrt(Din))).
    bound = 1.0 / (Din ** 0.5)
    weight = jax.random.uniform(k3, (Din, Dv), jnp.float32, -bound, bound)
    bias = jax.random.uniform(k4, (Dv,), jnp.float32, -bound, bound)

    out, alpha = mean_pool(hidden, encoder_outputs, weight, bias)
    out, alpha = jax.block_until_ready((out, alpha))

    # Cross-check against plain-JAX reference (linear-then-mean, as in PyTorch).
    ref_out = jnp.mean(encoder_outputs @ weight + bias, axis=1)
    ref_alpha = jax.nn.softmax(jnp.zeros((B, S), jnp.float32), axis=-1)
    assert jnp.allclose(out, ref_out, atol=1e-5, rtol=1e-5)
    assert jnp.allclose(alpha, ref_alpha, atol=1e-6)

    print("KERNEL_OK")
</pallas_src>

<mosaic_0001>
module attributes {stable_mosaic.version = 11 : i64} {
  func.func @_meanpool_fused_kernel(%arg0: i32, %arg1: i32, %arg2: memref<2x8x32xf32, #tpu.memory_space<vmem>>, %arg3: memref<32x32xf32, #tpu.memory_space<vmem>>, %arg4: memref<1x32xf32, #tpu.memory_space<vmem>>, %arg5: memref<2x32xf32, #tpu.memory_space<vmem>>, %arg6: memref<2x32xf32, #tpu.memory_space<vmem>>) attributes {dimension_semantics = [#tpu.dimension_semantics<parallel>, #tpu.dimension_semantics<arbitrary>], iteration_bounds = array<i64: 1, 1>, scalar_prefetch = 0 : i64, scratch_operands = 1 : i64, tpu.core_type = #tpu.core_type<tc>, window_params = [{transform_indices = @transform_0, window_bounds = array<i64: 2, 8, 32>}, {pipeline_mode = #tpu.pipeline_mode<synchronous>, transform_indices = @transform_1, window_bounds = array<i64: 32, 32>}, {pipeline_mode = #tpu.pipeline_mode<synchronous>, transform_indices = @transform_2, window_bounds = array<i64: 1, 32>}, {transform_indices = @transform_3, window_bounds = array<i64: 2, 32>}]} {
    %c0_i32 = arith.constant 0 : i32
    %0 = arith.cmpi eq, %arg1, %c0_i32 : i32
    %1 = arith.extui %0 : i1 to i32
    %c0_i32_0 = arith.constant 0 : i32
    %2 = arith.cmpi ne, %1, %c0_i32_0 : i32
    scf.if %2 {
      %cst_9 = arith.constant 0.000000e+00 : f32
      %11 = vector.broadcast %cst_9 : f32 to vector<2x32xf32>
      %c0_10 = arith.constant 0 : index
      %c0_11 = arith.constant 0 : index
      %12 = vector.load %arg6[%c0_10, %c0_11] : memref<2x32xf32, #tpu.memory_space<vmem>>, vector<2x32xf32>
      tpu.vector_store %arg6[%c0_10, %c0_11], %11 {strides = array<i32>} : memref<2x32xf32, #tpu.memory_space<vmem>>, vector<2x32xf32>,
    } else {
    }
    %c0 = arith.constant 0 : index
    %c0_1 = arith.constant 0 : index
    %3 = vector.load %arg6[%c0, %c0_1] : memref<2x32xf32, #tpu.memory_space<vmem>>, vector<2x32xf32>
    %c0_2 = arith.constant 0 : index
    %c0_3 = arith.constant 0 : index
    %c0_4 = arith.constant 0 : index
    %4 = vector.load %arg2[%c0_2, %c0_3, %c0_4] : memref<2x8x32xf32, #tpu.memory_space<vmem>>, vector<2x8x32xf32>
    %cst = arith.constant dense<0.000000e+00> : vector<2x32xf32>
    %5 = vector.multi_reduction <add>, %4, %cst [1] : vector<2x8x32xf32> to vector<2x32xf32>
    %6 = arith.addf %3, %5 : vector<2x32xf32>
    %c0_5 = arith.constant 0 : index
    %c0_6 = arith.constant 0 : index
    %7 = vector.load %arg6[%c0_5, %c0_6] : memref<2x32xf32, #tpu.memory_space<vmem>>, vector<2x32xf32>
    tpu.vector_store %arg6[%c0_5, %c0_6], %6 {strides = array<i32>} : memref<2x32xf32, #tpu.memory_space<vmem>>, vector<2x32xf32>,
    %c0_i32_7 = arith.constant 0 : i32
    %8 = arith.cmpi eq, %arg1, %c0_i32_7 : i32
    %9 = arith.extui %8 : i1 to i32
    %c0_i32_8 = arith.constant 0 : i32
    %10 = arith.cmpi ne, %9, %c0_i32_8 : i32
    scf.if %10 {
      %c0_9 = arith.constant 0 : index
      %c0_10 = arith.constant 0 : index
      %11 = vector.load %arg6[%c0_9, %c0_10] : memref<2x32xf32, #tpu.memory_space<vmem>>, vector<2x32xf32>
      %cst_11 = arith.constant 1.250000e-01 : f32
      %12 = vector.broadcast %cst_11 : f32 to vector<2x32xf32>
      %13 = arith.mulf %11, %12 : vector<2x32xf32>
      %c0_12 = arith.constant 0 : index
      %c0_13 = arith.constant 0 : index
      %14 = vector.load %arg3[%c0_12, %c0_13] : memref<32x32xf32, #tpu.memory_space<vmem>>, vector<32x32xf32>
      %cst_14 = arith.constant dense<0.000000e+00> : vector<2x32xf32>
      %15 = tpu.matmul %13, %14, %cst_14 {dimension_numbers = #tpu.dot_dimension_numbers<[1], [0], [0], [1], [0, 0, 1, 1], [], []>} : vector<2x32xf32>, vector<32x32xf32>, vector<2x32xf32> -> vector<2x32xf32>
      %c0_15 = arith.constant 0 : index
      %c0_16 = arith.constant 0 : index
      %16 = vector.load %arg4[%c0_15, %c0_16] : memref<1x32xf32, #tpu.memory_space<vmem>>, vector<1x32xf32>
      %17 = vector.broadcast %16 : vector<1x32xf32> to vector<2x32xf32>
      %18 = arith.addf %15, %17 : vector<2x32xf32>
      %c0_17 = arith.constant 0 : index
      %c0_18 = arith.constant 0 : index
      %19 = vector.load %arg5[%c0_17, %c0_18] : memref<2x32xf32, #tpu.memory_space<vmem>>, vector<2x32xf32>
      tpu.vector_store %arg5[%c0_17, %c0_18], %18 {strides = array<i32>} : memref<2x32xf32, #tpu.memory_space<vmem>>, vector<2x32xf32>,
    } else {
    }
    return
  }
  func.func @transform_0(%arg0: i32, %arg1: i32) -> (i32, i32, i32) {
    %c0_i32 = arith.constant 0 : i32
    %c0_i32_0 = arith.constant 0 : i32
    return %arg0, %arg1, %c0_i32 : i32, i32, i32
  }
  func.func @transform_1(%arg0: i32, %arg1: i32) -> (i32, i32) {
    %c0_i32 = arith.constant 0 : i32
    %c0_i32_0 = arith.constant 0 : i32
    %c0_i32_1 = arith.constant 0 : i32
    return %c0_i32, %c0_i32_0 : i32, i32
  }
  func.func @transform_2(%arg0: i32, %arg1: i32) -> (i32, i32) {
    %c0_i32 = arith.constant 0 : i32
    %c0_i32_0 = arith.constant 0 : i32
    %c0_i32_1 = arith.constant 0 : i32
    return %c0_i32, %c0_i32_0 : i32, i32
  }
  func.func @transform_3(%arg0: i32, %arg1: i32) -> (i32, i32) {
    %c0_i32 = arith.constant 0 : i32
    %c0_i32_0 = arith.constant 0 : i32
    return %arg0, %c0_i32 : i32, i32
  }
}

module attributes {stable_mosaic.version = 11 : i64} {
  func.func @_meanpool_fused_kernel(%arg0: i32, %arg1: i32, %arg2: memref<2x8x32xf32, #tpu.memory_space<vmem>>, %arg3: memref<32x32xf32, #tpu.memory_space<vmem>>, %arg4: memref<1x32xf32, #tpu.memory_space<vmem>>, %arg5: memref<2x32xf32, #tpu.memory_space<vmem>>, %arg6: memref<2x32xf32, #tpu.memory_space<vmem>>) attributes {dimension_semantics = [#tpu.dimension_semantics<parallel>, #tpu.dimension_semantics<arbitrary>], iteration_bounds = array<i64: 1, 1>, scalar_prefetch = 0 : i64, scratch_operands = 1 : i64, tpu.core_type = #tpu.core_type<tc>, window_params = [{transform_indices = @transform_0, window_bounds = array<i64: 2, 8, 32>}, {pipeline_mode = #tpu.pipeline_mode<synchronous>, transform_indices = @transform_1, window_bounds = array<i64: 32, 32>}, {pipeline_mode = #tpu.pipeline_mode<synchronous>, transform_indices = @transform_2, window_bounds = array<i64: 1, 32>}, {transform_indices = @transform_3, window_bounds = array<i64: 2, 32>}]} {
    %c0_i32 = arith.constant 0 : i32
    %0 = arith.cmpi eq, %arg1, %c0_i32 : i32
    %1 = arith.extui %0 : i1 to i32
    %c0_i32_0 = arith.constant 0 : i32
    %2 = arith.cmpi ne, %1, %c0_i32_0 : i32
    scf.if %2 {
      %cst_9 = arith.constant 0.000000e+00 : f32
      %11 = vector.broadcast %cst_9 : f32 to vector<2x32xf32>
      %c0_10 = arith.constant 0 : index
      %c0_11 = arith.constant 0 : index
      %12 = vector.load %arg6[%c0_10, %c0_11] : memref<2x32xf32, #tpu.memory_space<vmem>>, vector<2x32xf32>
      tpu.vector_store %arg6[%c0_10, %c0_11], %11 {strides = array<i32>} : memref<2x32xf32, #tpu.memory_space<vmem>>, vector<2x32xf32>,
    } else {
    }
    %c0 = arith.constant 0 : index
    %c0_1 = arith.constant 0 : index
    %3 = vector.load %arg6[%c0, %c0_1] : memref<2x32xf32, #tpu.memory_space<vmem>>, vector<2x32xf32>
    %c0_2 = arith.constant 0 : index
    %c0_3 = arith.constant 0 : index
    %c0_4 = arith.constant 0 : index
    %4 = vector.load %arg2[%c0_2, %c0_3, %c0_4] : memref<2x8x32xf32, #tpu.memory_space<vmem>>, vector<2x8x32xf32>
    %cst = arith.constant dense<0.000000e+00> : vector<2x32xf32>
    %5 = vector.multi_reduction <add>, %4, %cst [1] : vector<2x8x32xf32> to vector<2x32xf32>
    %6 = arith.addf %3, %5 : vector<2x32xf32>
    %c0_5 = arith.constant 0 : index
    %c0_6 = arith.constant 0 : index
    %7 = vector.load %arg6[%c0_5, %c0_6] : memref<2x32xf32, #tpu.memory_space<vmem>>, vector<2x32xf32>
    tpu.vector_store %arg6[%c0_5, %c0_6], %6 {strides = array<i32>} : memref<2x32xf32, #tpu.memory_space<vmem>>, vector<2x32xf32>,
    %c0_i32_7 = arith.constant 0 : i32
    %8 = arith.cmpi eq, %arg1, %c0_i32_7 : i32
    %9 = arith.extui %8 : i1 to i32
    %c0_i32_8 = arith.constant 0 : i32
    %10 = arith.cmpi ne, %9, %c0_i32_8 : i32
    scf.if %10 {
      %c0_9 = arith.constant 0 : index
      %c0_10 = arith.constant 0 : index
      %11 = vector.load %arg6[%c0_9, %c0_10] : memref<2x32xf32, #tpu.memory_space<vmem>>, vector<2x32xf32>
      %cst_11 = arith.constant 1.250000e-01 : f32
      %12 = vector.broadcast %cst_11 : f32 to vector<2x32xf32>
      %13 = arith.mulf %11, %12 : vector<2x32xf32>
      %c0_12 = arith.constant 0 : index
      %c0_13 = arith.constant 0 : index
      %14 = vector.load %arg3[%c0_12, %c0_13] : memref<32x32xf32, #tpu.memory_space<vmem>>, vector<32x32xf32>
      %cst_14 = arith.constant dense<0.000000e+00> : vector<2x32xf32>
      %15 = tpu.matmul %13, %14, %cst_14 {dimension_numbers = #tpu.dot_dimension_numbers<[1], [0], [0], [1], [0, 0, 1, 1], [], []>} : vector<2x32xf32>, vector<32x32xf32>, vector<2x32xf32> -> vector<2x32xf32>
      %c0_15 = arith.constant 0 : index
      %c0_16 = arith.constant 0 : index
      %16 = vector.load %arg4[%c0_15, %c0_16] : memref<1x32xf32, #tpu.memory_space<vmem>>, vector<1x32xf32>
      %17 = vector.broadcast %16 : vector<1x32xf32> to vector<2x32xf32>
      %18 = arith.addf %15, %17 : vector<2x32xf32>
      %c0_17 = arith.constant 0 : index
      %c0_18 = arith.constant 0 : index
      %19 = vector.load %arg5[%c0_17, %c0_18] : memref<2x32xf32, #tpu.memory_space<vmem>>, vector<2x32xf32>
      tpu.vector_store %arg5[%c0_17, %c0_18], %18 {strides = array<i32>} : memref<2x32xf32, #tpu.memory_space<vmem>>, vector<2x32xf32>,
    } else {
    }
    return
  }
  func.func @transform_0(%arg0: i32, %arg1: i32) -> (i32, i32, i32) {
    %c0_i32 = arith.constant 0 : i32
    %c0_i32_0 = arith.constant 0 : i32
    return %arg0, %arg1, %c0_i32 : i32, i32, i32
  }
  func.func @transform_1(%arg0: i32, %arg1: i32) -> (i32, i32) {
    %c0_i32 = arith.constant 0 : i32
    %c0_i32_0 = arith.constant 0 : i32
    %c0_i32_1 = arith.constant 0 : i32
    return %c0_i32, %c0_i32_0 : i32, i32
  }
  func.func @transform_2(%arg0: i32, %arg1: i32) -> (i32, i32) {
    %c0_i32 = arith.constant 0 : i32
    %c0_i32_0 = arith.constant 0 : i32
    %c0_i32_1 = arith.constant 0 : i32
    return %c0_i32, %c0_i32_0 : i32, i32
  }
  func.func @transform_3(%arg0: i32, %arg1: i32) -> (i32, i32) {
    %c0_i32 = arith.constant 0 : i32
    %c0_i32_0 = arith.constant 0 : i32
    return %arg0, %c0_i32 : i32, i32
  }
}

</mosaic_0001>

<bundles_post_ra>
// kernel: tpu_custom_call.1
= control target key start
LH: loop header
LB: loop body
LE: loop exit
PB: predicated region body
PF: predicated region fallthrough
CT: control target
= control target key end

     0   :  { %8 = vsyncpa [#allocation4], 0  ;;  %s358_s0 = inlined_call_operand.hbm [shape: f32[2,8,32], index: 0, kind: input, shape index: {}]   ;;  %s359_s1 = inlined_call_operand.hbm [shape: f32[32,32], index: 1, kind: input, shape index: {}]   ;;  %s360_s2 = inlined_call_operand.vmem [shape: f32[1,32], index: 2, kind: input, shape index: {}]   ;;  %s361_s3 = inlined_call_operand.hbm [shape: f32[2,32], index: 3, kind: output, shape index: {}]  }
   0x1   :  { %9 = vsyncpa [#allocation7], 0 }
   0x2   :  { %10 = vsyncpa [#allocation5], 0  ;;  %s285_s12 = smov [#allocation3]   ;;  %s213_s16 = scalar_lea.hbm %s358_s0, 256 }
   0x3   :  { %s16_s13 = sshll.u32 %s285_s12, 4  ;;  %p214_p0 = scmp.ne.s32.totalorder %s358_s0, %s213_s16  ;;  %s17_s13 = int_to_ptr.vmem [resolvable:$true] %s16_s13 }
   0x4   :  { %p217_p1 = scmp.lt.u32.totalorder %s213_s16, %s358_s0 }
   0x6   :  { %p219_p2 = pnand %p217_p1, %p214_p0 }
   0x8   :  { %222 = shalt.err (!%p219_p2)
}
   0x9   :  { %s223_s21 = scalar_lea.vmem %s17_s13, 256  ;;  %p228_p4 = scmp.lt.s32.totalorder %s17_s13, %s17_s13 }
   0xa   :  { %p224_p3 = scmp.ne.s32.totalorder %s17_s13, %s223_s21  ;;  %p229_p5 = scmp.lt.s32.totalorder %s223_s21, %s223_s21 }
   0xc   :  { %p230_p6 = por %p229_p5, %p228_p4 }
   0xe   :  { %p231_p7 = pnand %p230_p6, %p224_p3 }
  0x10   :  { %234 = shalt.err (!%p231_p7)
}
  0x11   :  { %s286_s22 = smov 128   ;;  %s287_s23 = smov 8  }
  0x12   :  { %22 = dma.hbm_to_vmem [thread:$0]  %s358_s0, 256, %s17_s13, [#allocation4], %s286_s22, %s286_s22, %s287_s23  }
  0x13   :  { %s288_s26 = smov [#allocation6]   ;;  %s235_s30 = scalar_lea.hbm %s359_s1, 512 }
  0x14   :  { %s28_s27 = sshll.u32 %s288_s26, 4  ;;  %p236_p8 = scmp.ne.s32.totalorder %s359_s1, %s235_s30  ;;  %s29_s27 = int_to_ptr.vmem [resolvable:$true] %s28_s27 }
  0x15   :  { %p239_p9 = scmp.lt.u32.totalorder %s235_s30, %s359_s1 }
  0x17   :  { %p241_p10 = pnand %p239_p9, %p236_p8 }
  0x19   :  { %244 = shalt.err (!%p241_p10)
}
  0x1a   :  { %s245_s8 = scalar_lea.vmem %s29_s27, 512  ;;  %p250_p12 = scmp.lt.s32.totalorder %s29_s27, %s29_s27 }
  0x1b   :  { %p246_p11 = scmp.ne.s32.totalorder %s29_s27, %s245_s8  ;;  %p251_p13 = scmp.lt.s32.totalorder %s245_s8, %s245_s8 }
  0x1d   :  { %p252_p0 = por %p251_p13, %p250_p12 }
  0x1f   :  { %p253_p1 = pnand %p252_p0, %p246_p11 }
  0x21   :  { %256 = shalt.err (!%p253_p1)
}
  0x22   :  { %34 = dma.hbm_to_vmem [thread:$0]  %s359_s1, 512, %s29_s27, [#allocation7], %s286_s22, %s286_s22, %s287_s23  }
  0x23   :  { %279 = dma.done.wait [#allocation4], 256  }
  0x24   :  { %280 = vsyncadd [#allocation4], 4294967040 }
  0x25   :  { %281 = dma.done.wait [#allocation7], 512  }
  0x26   :  { %282 = vsyncadd [#allocation7], 4294966784  ;;  %vm47_vm0 = vcmask 254976   ;;  %v289_v0 = vmov 0.0|0.0   ;;  %v290_v1 = vmov 0.0   ;;  %vm291_vm1 = vmmov 0  }
  0x27   :  { %199 = vmatprep.subr.bf16.mxu0 %v289_v0  ;;  %48 = vst.msk [vmem:[#allocation2] sm:$0x3] %vm47_vm0, %v290_v1  ;;  %196 = vmatprep.mubr.msk.f32.mxu0 %vm291_vm1, %v290_v1  ;;  %vm52_vm2 = vcmask 261120   ;;  %v80_v2 = vld [vmem:[#allocation6] sm:$0xff]  ;;  %v81_v3 = vld [vmem:[#allocation6 + $0x8] sm:$0xff]  ;;  %v82_v4 = vld [vmem:[#allocation6 + $0x10] sm:$0xff] }
  0x28   :  { %v200_v5 = vpack.c.bf16 %v81_v3, %v80_v2  ;;  %v83_v6 = vld [vmem:[#allocation6 + $0x18] sm:$0xff]  ;;  %v50_v7 = vld [vmem:[#allocation3] sm:$0xff]  ;;  %vm69_vm3 = vcmask 1041409   ;;  %v181_v29 = vld [vmem:[%s360_s2] ss:$0 sm:$0xff]  ;;  %s292_s11 = smov [#allocation8]  }
  0x29   :  { %v51_v8 = vld [vmem:[#allocation3 + $0x8] sm:$0xff]  ;;  %v53_v9 = vsel %vm52_vm2, %v50_v7, 0.0  ;;  %v203_v10 = vpack.c.bf16 %v83_v6, %v82_v4  ;;  %s171_s12 = sshll.u32 %s292_s11, 4  ;;  %s172_s12 = int_to_ptr.vmem [resolvable:$true] %s171_s12 }
  0x2a   :  { %201 = vmatpush3.bf16.msra.mxu0 %v200_v5  ;;  %v54_v11 = vrot.slane %v53_v9, 4  ;;  %v60_v12 = vsel %vm52_vm2, %v51_v8, 0.0  ;;  %s257_s13 = scalar_lea.vmem %s172_s12, 32  ;;  %p262_p3 = scmp.lt.s32.totalorder %s172_s12, %s172_s12 }
  0x2b   :  { %202 = vmatprep.subr.bf16.mxu0 %v289_v0  ;;  %v61_v13 = vrot.slane %v60_v12, 4  ;;  %p258_p2 = scmp.ne.s32.totalorder %s172_s12, %s257_s13  ;;  %p263_p4 = scmp.lt.s32.totalorder %s257_s13, %s257_s13 }
  0x2c   :  { %v55_v14 = vadd.f32 %v54_v11, %v53_v9 }
  0x2d   :  { %v62_v15 = vadd.f32 %v61_v13, %v60_v12  ;;  %p264_p5 = por %p263_p4, %p262_p3 }
  0x2e   :  { %204 = vmatpush3.bf16.msra.mxu0 %v203_v10  ;;  %v56_v16 = vrot.slane %v55_v14, 2  ;;  %v49_v23 = vld [vmem:[#allocation2] sm:$0x3] }
  0x2f   :  { %v63_v17 = vrot.slane %v62_v15, 2  ;;  %p265_p6 = pnand %p264_p5, %p258_p2 }
  0x30   :  { %v57_v18 = vadd.f32 %v56_v16, %v55_v14 }
  0x31   :  { %v64_v19 = vadd.f32 %v63_v17, %v62_v15 }
  0x32   :  { %v58_v20 = vrot.slane %v57_v18, 1 }
  0x33   :  { %v65_v21 = vrot.slane %v64_v19, 1 }
  0x34   :  { %v59_v22 = vadd.f32 %v58_v20, %v57_v18 }
  0x35   :  { %v66_v24 = vadd.f32 %v65_v21, %v64_v19 }
  0x37   :  { %v70_v25 = vsel %vm69_vm3, %v66_v24, %v59_v22 }
  0x38   :  { %v72_v26 = vadd.f32 %v70_v25, %v49_v23 }
  0x3a   :  { %74 = vst.msk [vmem:[#allocation2] sm:$0x3] %vm47_vm0, %v72_v26 }
  0x41   :  { %v78_v27 = vld [vmem:[#allocation2] sm:$0x3] }
  0x42   :  { %v79_v28 = vmul.f32 0.125, %v78_v27 }
  0x44   :  { %197 = vmatmul.mubr.msk.f32.vlgmr.msra.gmra.mrb[0].mxu0 %vm52_vm2, %v79_v28 }
 0x117   :  { %v160_v30 = vpop.f32.mrb[0].mxu0 }
 0x118   :  { %v161_v31 = vadd.f32 %v181_v29, %v160_v30  ;;  %v198_v32 = vpop.f32.mrb[1].mxu0 }
 0x11a   :  { %164 = vst.msk [vmem:[#allocation8] sm:$0x3] %vm47_vm0, %v161_v31 }
 0x11b   :  { %268 = shalt.err (!%p265_p6)
}
 0x11c   :  { %s269_s16 = scalar_lea.hbm %s361_s3, 32 }
 0x11d   :  { %p270_p7 = scmp.ne.s32.totalorder %s361_s3, %s269_s16  ;;  %p273_p8 = scmp.lt.u32.totalorder %s269_s16, %s361_s3 }
 0x11f   :  { %p275_p9 = pnand %p273_p8, %p270_p7 }
 0x121   :  { %278 = shalt.err (!%p275_p9)
}
 0x122   :  { %174 = dma.vmem_to_hbm [thread:$0]  %s172_s12, 32, %s361_s3, [#allocation5]  }
 0x123   :  { %283 = dma.done.wait [#allocation5], 32  }
 0x124   :  { %284 = vsyncadd [#allocation5], 4294967264 }
 0x125   :  { %178 = vsyncpa [#allocation4], 1 }
 0x126   :  { %179 = vsyncpa [#allocation7], 1 }
 0x127   :  { %180 = vsyncpa [#allocation5], 1 }

// kernel: tpu_custom_call.1
= control target key start
LH: loop header
LB: loop body
LE: loop exit
PB: predicated region body
PF: predicated region fallthrough
CT: control target
= control target key end

     0   :  { %8 = vsyncpa [#allocation4], 0  ;;  %s358_s0 = inlined_call_operand.hbm [shape: f32[2,8,32], index: 0, kind: input, shape index: {}]   ;;  %s359_s1 = inlined_call_operand.hbm [shape: f32[32,32], index: 1, kind: input, shape index: {}]   ;;  %s360_s2 = inlined_call_operand.vmem [shape: f32[1,32], index: 2, kind: input, shape index: {}]   ;;  %s361_s3 = inlined_call_operand.hbm [shape: f32[2,32], index: 3, kind: output, shape index: {}]  }
   0x1   :  { %9 = vsyncpa [#allocation7], 0 }
   0x2   :  { %10 = vsyncpa [#allocation5], 0  ;;  %s285_s12 = smov [#allocation3]   ;;  %s213_s16 = scalar_lea.hbm %s358_s0, 256 }
   0x3   :  { %s16_s13 = sshll.u32 %s285_s12, 4  ;;  %p214_p0 = scmp.ne.s32.totalorder %s358_s0, %s213_s16  ;;  %s17_s13 = int_to_ptr.vmem [resolvable:$true] %s16_s13 }
   0x4   :  { %p217_p1 = scmp.lt.u32.totalorder %s213_s16, %s358_s0 }
   0x6   :  { %p219_p2 = pnand %p217_p1, %p214_p0 }
   0x8   :  { %222 = shalt.err (!%p219_p2)
}
   0x9   :  { %s223_s21 = scalar_lea.vmem %s17_s13, 256  ;;  %p228_p4 = scmp.lt.s32.totalorder %s17_s13, %s17_s13 }
   0xa   :  { %p224_p3 = scmp.ne.s32.totalorder %s17_s13, %s223_s21  ;;  %p229_p5 = scmp.lt.s32.totalorder %s223_s21, %s223_s21 }
   0xc   :  { %p230_p6 = por %p229_p5, %p228_p4 }
   0xe   :  { %p231_p7 = pnand %p230_p6, %p224_p3 }
  0x10   :  { %234 = shalt.err (!%p231_p7)
}
  0x11   :  { %s286_s22 = smov 128   ;;  %s287_s23 = smov 8  }
  0x12   :  { %22 = dma.hbm_to_vmem [thread:$0]  %s358_s0, 256, %s17_s13, [#allocation4], %s286_s22, %s286_s22, %s287_s23  }
  0x13   :  { %s288_s26 = smov [#allocation6]   ;;  %s235_s30 = scalar_lea.hbm %s359_s1, 512 }
  0x14   :  { %s28_s27 = sshll.u32 %s288_s26, 4  ;;  %p236_p8 = scmp.ne.s32.totalorder %s359_s1, %s235_s30  ;;  %s29_s27 = int_to_ptr.vmem [resolvable:$true] %s28_s27 }
  0x15   :  { %p239_p9 = scmp.lt.u32.totalorder %s235_s30, %s359_s1 }
  0x17   :  { %p241_p10 = pnand %p239_p9, %p236_p8 }
  0x19   :  { %244 = shalt.err (!%p241_p10)
}
  0x1a   :  { %s245_s8 = scalar_lea.vmem %s29_s27, 512  ;;  %p250_p12 = scmp.lt.s32.totalorder %s29_s27, %s29_s27 }
  0x1b   :  { %p246_p11 = scmp.ne.s32.totalorder %s29_s27, %s245_s8  ;;  %p251_p13 = scmp.lt.s32.totalorder %s245_s8, %s245_s8 }
  0x1d   :  { %p252_p0 = por %p251_p13, %p250_p12 }
  0x1f   :  { %p253_p1 = pnand %p252_p0, %p246_p11 }
  0x21   :  { %256 = shalt.err (!%p253_p1)
}
  0x22   :  { %34 = dma.hbm_to_vmem [thread:$0]  %s359_s1, 512, %s29_s27, [#allocation7], %s286_s22, %s286_s22, %s287_s23  }
  0x23   :  { %279 = dma.done.wait [#allocation4], 256  }
  0x24   :  { %280 = vsyncadd [#allocation4], 4294967040 }
  0x25   :  { %281 = dma.done.wait [#allocation7], 512  }
  0x26   :  { %282 = vsyncadd [#allocation7], 4294966784  ;;  %vm47_vm0 = vcmask 254976   ;;  %v289_v0 = vmov 0.0|0.0   ;;  %v290_v1 = vmov 0.0   ;;  %vm291_vm1 = vmmov 0  }
  0x27   :  { %199 = vmatprep.subr.bf16.mxu0 %v289_v0  ;;  %48 = vst.msk [vmem:[#allocation2] sm:$0x3] %vm47_vm0, %v290_v1  ;;  %196 = vmatprep.mubr.msk.f32.mxu0 %vm291_vm1, %v290_v1  ;;  %vm52_vm2 = vcmask 261120   ;;  %v80_v2 = vld [vmem:[#allocation6] sm:$0xff]  ;;  %v81_v3 = vld [vmem:[#allocation6 + $0x8] sm:$0xff]  ;;  %v82_v4 = vld [vmem:[#allocation6 + $0x10] sm:$0xff] }
  0x28   :  { %v200_v5 = vpack.c.bf16 %v81_v3, %v80_v2  ;;  %v83_v6 = vld [vmem:[#allocation6 + $0x18] sm:$0xff]  ;;  %v50_v7 = vld [vmem:[#allocation3] sm:$0xff]  ;;  %vm69_vm3 = vcmask 1041409   ;;  %v181_v29 = vld [vmem:[%s360_s2] ss:$0 sm:$0xff]  ;;  %s292_s11 = smov [#allocation8]  }
  0x29   :  { %v51_v8 = vld [vmem:[#allocation3 + $0x8] sm:$0xff]  ;;  %v53_v9 = vsel %vm52_vm2, %v50_v7, 0.0  ;;  %v203_v10 = vpack.c.bf16 %v83_v6, %v82_v4  ;;  %s171_s12 = sshll.u32 %s292_s11, 4  ;;  %s172_s12 = int_to_ptr.vmem [resolvable:$true] %s171_s12 }
  0x2a   :  { %201 = vmatpush3.bf16.msra.mxu0 %v200_v5  ;;  %v54_v11 = vrot.slane %v53_v9, 4  ;;  %v60_v12 = vsel %vm52_vm2, %v51_v8, 0.0  ;;  %s257_s13 = scalar_lea.vmem %s172_s12, 32  ;;  %p262_p3 = scmp.lt.s32.totalorder %s172_s12, %s172_s12 }
  0x2b   :  { %202 = vmatprep.subr.bf16.mxu0 %v289_v0  ;;  %v61_v13 = vrot.slane %v60_v12, 4  ;;  %p258_p2 = scmp.ne.s32.totalorder %s172_s12, %s257_s13  ;;  %p263_p4 = scmp.lt.s32.totalorder %s257_s13, %s257_s13 }
  0x2c   :  { %v55_v14 = vadd.f32 %v54_v11, %v53_v9 }
  0x2d   :  { %v62_v15 = vadd.f32 %v61_v13, %v60_v12  ;;  %p264_p5 = por %p263_p4, %p262_p3 }
  0x2e   :  { %204 = vmatpush3.bf16.msra.mxu0 %v203_v10  ;;  %v56_v16 = vrot.slane %v55_v14, 2  ;;  %v49_v23 = vld [vmem:[#allocation2] sm:$0x3] }
  0x2f   :  { %v63_v17 = vrot.slane %v62_v15, 2  ;;  %p265_p6 = pnand %p264_p5, %p258_p2 }
  0x30   :  { %v57_v18 = vadd.f32 %v56_v16, %v55_v14 }
  0x31   :  { %v64_v19 = vadd.f32 %v63_v17, %v62_v15 }
  0x32   :  { %v58_v20 = vrot.slane %v57_v18, 1 }
  0x33   :  { %v65_v21 = vrot.slane %v64_v19, 1 }
  0x34   :  { %v59_v22 = vadd.f32 %v58_v20, %v57_v18 }
  0x35   :  { %v66_v24 = vadd.f32 %v65_v21, %v64_v19 }
  0x37   :  { %v70_v25 = vsel %vm69_vm3, %v66_v24, %v59_v22 }
  0x38   :  { %v72_v26 = vadd.f32 %v70_v25, %v49_v23 }
  0x3a   :  { %74 = vst.msk [vmem:[#allocation2] sm:$0x3] %vm47_vm0, %v72_v26 }
  0x41   :  { %v78_v27 = vld [vmem:[#allocation2] sm:$0x3] }
  0x42   :  { %v79_v28 = vmul.f32 0.125, %v78_v27 }
  0x44   :  { %197 = vmatmul.mubr.msk.f32.vlgmr.msra.gmra.mrb[0].mxu0 %vm52_vm2, %v79_v28 }
 0x117   :  { %v160_v30 = vpop.f32.mrb[0].mxu0 }
 0x118   :  { %v161_v31 = vadd.f32 %v181_v29, %v160_v30  ;;  %v198_v32 = vpop.f32.mrb[1].mxu0 }
 0x11a   :  { %164 = vst.msk [vmem:[#allocation8] sm:$0x3] %vm47_vm0, %v161_v31 }
 0x11b   :  { %268 = shalt.err (!%p265_p6)
}
 0x11c   :  { %s269_s16 = scalar_lea.hbm %s361_s3, 32 }
 0x11d   :  { %p270_p7 = scmp.ne.s32.totalorder %s361_s3, %s269_s16  ;;  %p273_p8 = scmp.lt.u32.totalorder %s269_s16, %s361_s3 }
 0x11f   :  { %p275_p9 = pnand %p273_p8, %p270_p7 }
 0x121   :  { %278 = shalt.err (!%p275_p9)
}
 0x122   :  { %174 = dma.vmem_to_hbm [thread:$0]  %s172_s12, 32, %s361_s3, [#allocation5]  }
 0x123   :  { %283 = dma.done.wait [#allocation5], 32  }
 0x124   :  { %284 = vsyncadd [#allocation5], 4294967264 }
 0x125   :  { %178 = vsyncpa [#allocation4], 1 }
 0x126   :  { %179 = vsyncpa [#allocation7], 1 }
 0x127   :  { %180 = vsyncpa [#allocation5], 1 }

</bundles_post_ra>
